<compile_context>
chip_gen: v7x
topology: tpu7x:2x2x1
jax: 0.10.0
libtpu: 0.0.40
codegen_flags: <defaults>
</compile_context>

<pallas_src>
import math

import jax
import jax.numpy as jnp
from jax.experimental import pallas as pl
from jax.experimental.pallas import tpu as pltpu


def _round_up(x, m):
    return (x + m - 1) // m * m


def _vmem_capacity_bytes():
    """Best-effort per-TensorCore VMEM capacity (capability probe only)."""
    cap = None
    try:
        cap = int(pltpu.get_tpu_info().vmem_capacity_bytes)
    except Exception:  # probe only -- never masks kernel/lowering errors
        cap = None
    try:
        kind = jax.devices()[0].device_kind.lower()
    except Exception:
        kind = ""
    if cap is None:
        cap = (128 << 20) if any(g in kind for g in ("v4", "v5", "v6")) else (64 << 20)
    if "v7" in kind:
        cap = min(cap, 64 << 20)  # 64 MiB per TensorCore on v7x
    return cap


def _make_mlp_kernel(accumulate_into_out, compute_dtype):
    """Builds the fused fc1->ReLU->(dropout: identity)->fc2 kernel body."""

    def compute_slab(x_ref, w1_ref, b1_ref, w2_ref):
        # x:(tm,Ep) native dtype, W1:(Ep,th) bf16, b1:(1,th) f32, W2:(th,tn) bf16
        xb = x_ref[...].astype(compute_dtype)
        h = jnp.dot(xb, w1_ref[...], preferred_element_type=jnp.float32)
        h = jnp.maximum(h + b1_ref[...], 0.0)  # bias + ReLU in f32 on the VPU
        # dropout: identity in eval mode.
        # TODO(synk): training-mode dropout mask via pltpu.prng_random_bits.
        # NOTE: h cast to bf16 for the fc2 MXU pass (documented precision loss).
        return jnp.dot(h.astype(compute_dtype), w2_ref[...],
                       preferred_element_type=jnp.float32)

    if accumulate_into_out:
        # f32 output: accumulate directly into the resident output block.
        def kernel(x_ref, w1_ref, b1_ref, w2_ref, b2_ref, o_ref):
            k = pl.program_id(2)

            @pl.when(k == 0)
            def _():
                o_ref[...] = jnp.zeros_like(o_ref)

            o_ref[...] += compute_slab(x_ref, w1_ref, b1_ref, w2_ref)

            @pl.when(k == pl.num_programs(2) - 1)
            def _():
                o_ref[...] += b2_ref[...]
    else:
        def kernel(x_ref, w1_ref, b1_ref, w2_ref, b2_ref, o_ref, acc_ref):
            k = pl.program_id(2)

            @pl.when(k == 0)
            def _():
                acc_ref[...] = jnp.zeros_like(acc_ref)

            acc_ref[...] += compute_slab(x_ref, w1_ref, b1_ref, w2_ref)

            @pl.when(k == pl.num_programs(2) - 1)
            def _():
                o_ref[...] = (acc_ref[...] + b2_ref[...]).astype(o_ref.dtype)

    return kernel


def _plan_tiles(M, Ep, th, x_itemsize, out_itemsize, vmem_budget, tm_max, tn_max=None):
    """Pick (tm, tn) so double-buffered blocks fit the VMEM budget."""
    tn_cap = Ep if tn_max is None else max(128, min(Ep, tn_max))

    def usage(tm, tn):
        return (2 * tm * Ep * x_itemsize              # x block (native dtype), 2 bufs
                + 2 * Ep * th * 2                     # W1 slab (bf16), 2 bufs
                + 2 * th * tn * 2                     # W2 slab (bf16), 2 bufs
                + 2 * (th + tn) * 4                   # biases (f32)
                + 2 * tm * tn * out_itemsize          # output block, 2 bufs
                + (0 if out_itemsize == 4 else tm * tn * 4)  # f32 acc scratch
                + tm * th * 4)                        # fc1 intermediate headroom

    tm_cap = min(_round_up(max(M, 1), 16), max(16, tm_max))
    tm_opts = []
    for t in (512, 256, 128, 64, 32, 16):
        t = min(t, tm_cap)
        if t not in tm_opts:
            tm_opts.append(t)

    tn_opts = []
    for t in (Ep, Ep // 2, Ep // 4, 128):
        if 128 <= t <= tn_cap and t % 128 == 0 and Ep % t == 0 and t not in tn_opts:
            tn_opts.append(t)
    if not tn_opts:
        tn_opts = [128 if Ep % 128 == 0 else Ep]

    for tm in tm_opts:
        for tn in tn_opts:
            if usage(tm, tn) <= vmem_budget:
                return tm, tn, usage(tm, tn)
    tm, tn = tm_opts[-1], tn_opts[-1]
    return tm, tn, usage(tm, tn)


def prepare_mlp_params(w1, b1, w2, b2, *, th_max=512, compute_dtype=jnp.bfloat16):
    """Pad + cast parameters ONCE (hoisted out of the per-call hot path).

    w1: (E, H), b1: (H,), w2: (H, E), b2: (E,)  -- nn.Linear weights transposed.
    """
    E, H = w1.shape
    assert w2.shape == (H, E) and b1.shape == (H,) and b2.shape == (E,)

    th_max = max(128, (th_max // 128) * 128)
    Ep = _round_up(E, 128)
    th = min(th_max, _round_up(H, 128))   # pick the slab size first ...
    Hp = _round_up(H, th)                 # ... then pad H up to a multiple of it

    if (Ep, Hp) != (E, H):
        w1 = jnp.pad(w1, ((0, Ep - E), (0, Hp - H)))
        w2 = jnp.pad(w2, ((0, Hp - H), (0, Ep - E)))
    if Hp != H:
        b1 = jnp.pad(b1, (0, Hp - H))
    if Ep != E:
        b2 = jnp.pad(b2, (0, Ep - E))

    return dict(
        w1=jnp.asarray(w1, compute_dtype),
        w2=jnp.asarray(w2, compute_dtype),
        b1=jnp.asarray(b1, jnp.float32).reshape(1, Hp),
        b2=jnp.asarray(b2, jnp.float32).reshape(1, Ep),
        E=E, H=H, Ep=Ep, Hp=Hp, th=th, compute_dtype=compute_dtype,
    )


def mlp_forward(x, params, *, tm_max=None, tn_max=None):
    """x: (..., E) -> (..., E). Params from prepare_mlp_params."""
    E, H = params["E"], params["H"]
    Ep, Hp, th = params["Ep"], params["Hp"], params["th"]
    compute_dtype = params["compute_dtype"]
    w_itemsize = jnp.dtype(compute_dtype).itemsize

    orig_shape = x.shape
    assert orig_shape[-1] == E, f"expected last dim {E}, got {orig_shape}"
    M = int(math.prod(orig_shape[:-1]))
    x2d = x.reshape(M, E)
    out_dtype = x.dtype
    out_itemsize = jnp.dtype(out_dtype).itemsize
    x_itemsize = jnp.dtype(x.dtype).itemsize

    # --- generation-aware tile plan -----------------------------------------
    vmem_cap = _vmem_capacity_bytes()
    if vmem_cap >= (96 << 20):            # v5e / v6e: 128 MiB VMEM -> big row tiles
        gen_tm_max = 512
        budget = min(vmem_cap - (24 << 20), 104 << 20)
    else:                                 # v7x (64 MiB / TC) or unknown: conservative
        gen_tm_max = 256
        budget = max(vmem_cap - (16 << 20), 32 << 20)
    tm_max = gen_tm_max if tm_max is None else tm_max

    tm, tn, usage = _plan_tiles(M, Ep, th, x_itemsize, out_itemsize,
                                budget, tm_max, tn_max)
    Mp = _round_up(M, tm)

    # v7x has 2 TensorCores sharded over "parallel" axes: if there is only one
    # row tile and one E tile, split E so both cores get work.
    if vmem_cap < (96 << 20) and Mp // tm == 1 and Ep // tn == 1 and Ep % 256 == 0:
        tn = Ep // 2

    n_i, n_e, n_h = Mp // tm, Ep // tn, Hp // th

    # --- pad x only when required --------------------------------------------
    if Mp != M or Ep != E:
        x2d = jnp.pad(x2d, ((0, Mp - M), (0, Ep - E)))

    accumulate_into_out = (out_dtype == jnp.dtype(jnp.float32))
    kernel = _make_mlp_kernel(accumulate_into_out, compute_dtype)
    scratch_shapes = () if accumulate_into_out else (pltpu.VMEM((tm, tn), jnp.float32),)

    # --- cost model (counts weight re-streaming) ------------------------------
    flops = 2 * Mp * Ep * Hp * (n_e + 1)            # fc1 recomputed per E tile + fc2
    bytes_accessed = (Mp * Ep * x_itemsize                        # x streamed once
                      + n_i * n_e * Ep * Hp * w_itemsize          # W1 per (row, E) tile
                      + n_i * Hp * Ep * w_itemsize                # W2 per row tile
                      + n_i * n_e * n_h * (th + tn) * 4           # biases
                      + Mp * Ep * out_itemsize)                   # output written once

    grid_spec = pltpu.PrefetchScalarGridSpec(
        num_scalar_prefetch=0,
        grid=(n_i, n_e, n_h),
        in_specs=[
            pl.BlockSpec((tm, Ep), lambda i, n, k: (i, 0)),   # x rows (full E)
            pl.BlockSpec((Ep, th), lambda i, n, k: (0, k)),   # W1 hidden slab
            pl.BlockSpec((1, th), lambda i, n, k: (0, k)),    # b1 slab
            pl.BlockSpec((th, tn), lambda i, n, k: (k, n)),   # W2 slab
            pl.BlockSpec((1, tn), lambda i, n, k: (0, n)),    # b2 slab
        ],
        out_specs=pl.BlockSpec((tm, tn), lambda i, n, k: (i, n)),
        scratch_shapes=scratch_shapes,
    )

    vmem_limit = int(min(vmem_cap, max(usage + (8 << 20), 32 << 20)))

    out = pl.pallas_call(
        kernel,
        out_shape=jax.ShapeDtypeStruct((Mp, Ep), out_dtype),
        grid_spec=grid_spec,
        compiler_params=pltpu.CompilerParams(
            dimension_semantics=("parallel", "parallel", "arbitrary"),
            vmem_limit_bytes=vmem_limit),
        cost_estimate=pl.CostEstimate(
            flops=int(flops), transcendentals=0, bytes_accessed=int(bytes_accessed)),
    )(x2d, params["w1"], params["b1"], params["w2"], params["b2"])

    if Mp != M or Ep != E:
        out = out[:M, :E]
    return out.reshape(orig_shape)


def init_params(key, embedding_dimension, hidden_dimension, dtype=jnp.float32):
    """Deterministic init matching nn.Linear shapes (weights stored transposed: (in, out))."""
    k1, k2, k3, k4 = jax.random.split(key, 4)
    lim1 = 1.0 / (embedding_dimension ** 0.5)
    lim2 = 1.0 / (hidden_dimension ** 0.5)
    w1 = jax.random.uniform(k1, (embedding_dimension, hidden_dimension), dtype, -lim1, lim1)
    b1 = jax.random.uniform(k2, (hidden_dimension,), dtype, -lim1, lim1)
    w2 = jax.random.uniform(k3, (hidden_dimension, embedding_dimension), dtype, -lim2, lim2)
    b2 = jax.random.uniform(k4, (embedding_dimension,), dtype, -lim2, lim2)
    return w1, b1, w2, b2


def _ref_mlp(x, w1, b1, w2, b2):
    E = x.shape[-1]
    h = jnp.maximum(x.reshape(-1, E) @ w1 + b1, 0.0)
    return (h @ w2 + b2).reshape(x.shape)


if __name__ == "__main__":
    key = jax.random.PRNGKey(0)
    kx, kp = jax.random.split(key)

    # Small config consistent with MultiLayerPerceptron(embed=32, hidden=64, dropout)
    batch, seq, embed, hidden = 2, 8, 32, 64
    x = jax.random.normal(kx, (batch, seq, embed), jnp.float32)
    w1, b1, w2, b2 = init_params(kp, embed, hidden)

    params = prepare_mlp_params(w1, b1, w2, b2)      # pad + cast once, off the hot path
    out = jax.block_until_ready(mlp_forward(x, params))

    ref = _ref_mlp(x, w1, b1, w2, b2)
    assert out.shape == ref.shape
    max_diff = float(jnp.max(jnp.abs(out - ref)))
    assert jnp.allclose(out, ref, atol=5e-2, rtol=5e-2), (
        f"mismatch vs reference, max abs diff {max_diff}")

    # Second small check exercising the H-reduction (k) and output-E (n) grid
    # axes, including hidden-dim padding (320 -> 384 with th=128).
    embed2, hidden2 = 256, 320
    x2 = jax.random.normal(kx, (batch, seq, embed2), jnp.float32)
    w1b, b1b, w2b, b2b = init_params(kp, embed2, hidden2)
    params2 = prepare_mlp_params(w1b, b1b, w2b, b2b, th_max=128)
    out2 = jax.block_until_ready(mlp_forward(x2, params2, tn_max=128))
    ref2 = _ref_mlp(x2, w1b, b1b, w2b, b2b)
    max_diff2 = float(jnp.max(jnp.abs(out2 - ref2)))
    assert jnp.allclose(out2, ref2, atol=5e-2, rtol=5e-2), (
        f"mismatch vs reference (tiled case), max abs diff {max_diff2}")

    print("KERNEL_OK")
</pallas_src>

<mosaic_0001>
module attributes {stable_mosaic.version = 11 : i64} {
  func.func @kernel(%arg0: i32, %arg1: i32, %arg2: i32, %arg3: memref<16x128xf32, #tpu.memory_space<vmem>>, %arg4: memref<128x128xbf16, #tpu.memory_space<vmem>>, %arg5: memref<1x128xf32, #tpu.memory_space<vmem>>, %arg6: memref<128x128xbf16, #tpu.memory_space<vmem>>, %arg7: memref<1x128xf32, #tpu.memory_space<vmem>>, %arg8: memref<16x128xf32, #tpu.memory_space<vmem>>) attributes {dimension_semantics = [#tpu.dimension_semantics<parallel>, #tpu.dimension_semantics<parallel>, #tpu.dimension_semantics<arbitrary>], iteration_bounds = array<i64: 1, 1, 1>, scalar_prefetch = 0 : i64, scratch_operands = 0 : i64, tpu.core_type = #tpu.core_type<tc>, window_params = [{transform_indices = @transform_0, window_bounds = array<i64: 16, 128>}, {transform_indices = @transform_1, window_bounds = array<i64: 128, 128>}, {transform_indices = @transform_2, window_bounds = array<i64: 1, 128>}, {transform_indices = @transform_3, window_bounds = array<i64: 128, 128>}, {transform_indices = @transform_4, window_bounds = array<i64: 1, 128>}, {transform_indices = @transform_5, window_bounds = array<i64: 16, 128>}]} {
    %c0_i32 = arith.constant 0 : i32
    %0 = arith.cmpi eq, %arg2, %c0_i32 : i32
    %1 = arith.extui %0 : i1 to i32
    %c0_i32_0 = arith.constant 0 : i32
    %2 = arith.cmpi ne, %1, %c0_i32_0 : i32
    scf.if %2 {
      %cst_16 = arith.constant 0.000000e+00 : f32
      %21 = vector.broadcast %cst_16 : f32 to vector<16x128xf32>
      %c0_17 = arith.constant 0 : index
      %c0_18 = arith.constant 0 : index
      %22 = vector.load %arg8[%c0_17, %c0_18] : memref<16x128xf32, #tpu.memory_space<vmem>>, vector<16x128xf32>
      tpu.vector_store %arg8[%c0_17, %c0_18], %21 {strides = array<i32>} : memref<16x128xf32, #tpu.memory_space<vmem>>, vector<16x128xf32>,
    } else {
    }
    %c0 = arith.constant 0 : index
    %c0_1 = arith.constant 0 : index
    %3 = vector.load %arg8[%c0, %c0_1] : memref<16x128xf32, #tpu.memory_space<vmem>>, vector<16x128xf32>
    %c0_2 = arith.constant 0 : index
    %c0_3 = arith.constant 0 : index
    %4 = vector.load %arg3[%c0_2, %c0_3] : memref<16x128xf32, #tpu.memory_space<vmem>>, vector<16x128xf32>
    %5 = arith.truncf %4 : vector<16x128xf32> to vector<16x128xbf16>
    %c0_4 = arith.constant 0 : index
    %c0_5 = arith.constant 0 : index
    %6 = vector.load %arg4[%c0_4, %c0_5] : memref<128x128xbf16, #tpu.memory_space<vmem>>, vector<128x128xbf16>
    %cst = arith.constant dense<0.000000e+00> : vector<16x128xf32>
    %7 = tpu.matmul %5, %6, %cst {dimension_numbers = #tpu.dot_dimension_numbers<[1], [0], [0], [1], [0, 0, 1, 1], [], []>} : vector<16x128xbf16>, vector<128x128xbf16>, vector<16x128xf32> -> vector<16x128xf32>
    %c0_6 = arith.constant 0 : index
    %c0_7 = arith.constant 0 : index
    %8 = vector.load %arg5[%c0_6, %c0_7] : memref<1x128xf32, #tpu.memory_space<vmem>>, vector<1x128xf32>
    %9 = vector.broadcast %8 : vector<1x128xf32> to vector<16x128xf32>
    %10 = arith.addf %7, %9 : vector<16x128xf32>
    %cst_8 = arith.constant 0.000000e+00 : f32
    %11 = vector.broadcast %cst_8 : f32 to vector<16x128xf32>
    %12 = arith.maximumf %10, %11 : vector<16x128xf32>
    %13 = arith.truncf %12 : vector<16x128xf32> to vector<16x128xbf16>
    %c0_9 = arith.constant 0 : index
    %c0_10 = arith.constant 0 : index
    %14 = vector.load %arg6[%c0_9, %c0_10] : memref<128x128xbf16, #tpu.memory_space<vmem>>, vector<128x128xbf16>
    %cst_11 = arith.constant dense<0.000000e+00> : vector<16x128xf32>
    %15 = tpu.matmul %13, %14, %cst_11 {dimension_numbers = #tpu.dot_dimension_numbers<[1], [0], [0], [1], [0, 0, 1, 1], [], []>} : vector<16x128xbf16>, vector<128x128xbf16>, vector<16x128xf32> -> vector<16x128xf32>
    %16 = arith.addf %3, %15 : vector<16x128xf32>
    %c0_12 = arith.constant 0 : index
    %c0_13 = arith.constant 0 : index
    %17 = vector.load %arg8[%c0_12, %c0_13] : memref<16x128xf32, #tpu.memory_space<vmem>>, vector<16x128xf32>
    tpu.vector_store %arg8[%c0_12, %c0_13], %16 {strides = array<i32>} : memref<16x128xf32, #tpu.memory_space<vmem>>, vector<16x128xf32>,
    %c0_i32_14 = arith.constant 0 : i32
    %18 = arith.cmpi eq, %arg2, %c0_i32_14 : i32
    %19 = arith.extui %18 : i1 to i32
    %c0_i32_15 = arith.constant 0 : i32
    %20 = arith.cmpi ne, %19, %c0_i32_15 : i32
    scf.if %20 {
      %c0_16 = arith.constant 0 : index
      %c0_17 = arith.constant 0 : index
      %21 = vector.load %arg8[%c0_16, %c0_17] : memref<16x128xf32, #tpu.memory_space<vmem>>, vector<16x128xf32>
      %c0_18 = arith.constant 0 : index
      %c0_19 = arith.constant 0 : index
      %22 = vector.load %arg7[%c0_18, %c0_19] : memref<1x128xf32, #tpu.memory_space<vmem>>, vector<1x128xf32>
      %23 = vector.broadcast %22 : vector<1x128xf32> to vector<16x128xf32>
      %24 = arith.addf %21, %23 : vector<16x128xf32>
      %c0_20 = arith.constant 0 : index
      %c0_21 = arith.constant 0 : index
      %25 = vector.load %arg8[%c0_20, %c0_21] : memref<16x128xf32, #tpu.memory_space<vmem>>, vector<16x128xf32>
      tpu.vector_store %arg8[%c0_20, %c0_21], %24 {strides = array<i32>} : memref<16x128xf32, #tpu.memory_space<vmem>>, vector<16x128xf32>,
    } else {
    }
    return
  }
  func.func @transform_0(%arg0: i32, %arg1: i32, %arg2: i32) -> (i32, i32) {
    %c0_i32 = arith.constant 0 : i32
    %c0_i32_0 = arith.constant 0 : i32
    return %arg0, %c0_i32 : i32, i32
  }
  func.func @transform_1(%arg0: i32, %arg1: i32, %arg2: i32) -> (i32, i32) {
    %c0_i32 = arith.constant 0 : i32
    %c0_i32_0 = arith.constant 0 : i32
    return %c0_i32, %arg2 : i32, i32
  }
  func.func @transform_2(%arg0: i32, %arg1: i32, %arg2: i32) -> (i32, i32) {
    %c0_i32 = arith.constant 0 : i32
    %c0_i32_0 = arith.constant 0 : i32
    return %c0_i32, %arg2 : i32, i32
  }
  func.func @transform_3(%arg0: i32, %arg1: i32, %arg2: i32) -> (i32, i32) {
    %c0_i32 = arith.constant 0 : i32
    return %arg2, %arg1 : i32, i32
  }
  func.func @transform_4(%arg0: i32, %arg1: i32, %arg2: i32) -> (i32, i32) {
    %c0_i32 = arith.constant 0 : i32
    %c0_i32_0 = arith.constant 0 : i32
    return %c0_i32, %arg1 : i32, i32
  }
  func.func @transform_5(%arg0: i32, %arg1: i32, %arg2: i32) -> (i32, i32) {
    %c0_i32 = arith.constant 0 : i32
    return %arg0, %arg1 : i32, i32
  }
}

</mosaic_0001>

<bundles_post_ra>
// kernel: tpu_custom_call.1
= control target key start
LH: loop header
LB: loop body
LE: loop exit
PB: predicated region body
PF: predicated region fallthrough
CT: control target
= control target key end

     0   :  { %10 = vsyncpa [#allocation3], 0  ;;  %s634_s0 = inlined_call_operand.hbm [shape: f32[16,128], index: 0, kind: input, shape index: {}]   ;;  %s635_s1 = inlined_call_operand.hbm [shape: bf16[128,128], index: 1, kind: input, shape index: {}]   ;;  %s636_s2 = inlined_call_operand.vmem [shape: f32[1,128], index: 2, kind: input, shape index: {}]   ;;  %s637_s3 = inlined_call_operand.hbm [shape: bf16[128,128], index: 3, kind: input, shape index: {}]   ;;  %s638_s4 = inlined_call_operand.vmem [shape: f32[1,128], index: 4, kind: input, shape index: {}]   ;;  %s639_s5 = inlined_call_operand.hbm [shape: f32[16,128], index: 5, kind: output, shape index: {}]  }
   0x1   :  { %11 = vsyncpa [#allocation6], 0 }
   0x2   :  { %12 = vsyncpa [#allocation4], 0  ;;  %s528_s18 = smov [#allocation5]   ;;  %s434_s22 = scalar_lea.hbm %s635_s1, 1024 }
   0x3   :  { %s30_s19 = sshll.u32 %s528_s18, 4  ;;  %p435_p0 = scmp.ne.s32.totalorder %s635_s1, %s434_s22  ;;  %s31_s19 = int_to_ptr.vmem [resolvable:$true] %s30_s19 }
   0x4   :  { %p438_p1 = scmp.lt.u32.totalorder %s434_s22, %s635_s1 }
   0x6   :  { %p440_p2 = pnand %p438_p1, %p435_p0 }
   0x8   :  { %443 = shalt.err (!%p440_p2)
}
   0x9   :  { %s444_s27 = scalar_lea.vmem %s31_s19, 1024  ;;  %p449_p4 = scmp.lt.s32.totalorder %s31_s19, %s31_s19 }
   0xa   :  { %p445_p3 = scmp.ne.s32.totalorder %s31_s19, %s444_s27  ;;  %p450_p5 = scmp.lt.s32.totalorder %s444_s27, %s444_s27 }
   0xc   :  { %p451_p6 = por %p450_p5, %p449_p4 }
   0xe   :  { %p452_p7 = pnand %p451_p6, %p445_p3 }
  0x10   :  { %455 = shalt.err (!%p452_p7)
}
  0x11   :  { %s529_s28 = smov 64   ;;  %s530_s29 = smov 4  }
  0x12   :  { %36 = dma.hbm_to_vmem [thread:$0]  %s635_s1, 1024, %s31_s19, [#allocation6], %s529_s28, %s529_s28, %s530_s29  }
  0x13   :  { %s531_s7 = smov [#allocation2]   ;;  %s456_s11 = scalar_lea.hbm %s634_s0, 256 }
  0x14   :  { %s18_s8 = sshll.u32 %s531_s7, 4  ;;  %p457_p8 = scmp.ne.s32.totalorder %s634_s0, %s456_s11  ;;  %s19_s8 = int_to_ptr.vmem [resolvable:$true] %s18_s8 }
  0x15   :  { %p460_p9 = scmp.lt.u32.totalorder %s456_s11, %s634_s0 }
  0x17   :  { %p462_p10 = pnand %p460_p9, %p457_p8 }
  0x19   :  { %465 = shalt.err (!%p462_p10)
}
  0x1a   :  { %s466_s16 = scalar_lea.vmem %s19_s8, 256  ;;  %p471_p12 = scmp.lt.s32.totalorder %s19_s8, %s19_s8 }
  0x1b   :  { %p467_p11 = scmp.ne.s32.totalorder %s19_s8, %s466_s16  ;;  %p472_p13 = scmp.lt.s32.totalorder %s466_s16, %s466_s16 }
  0x1d   :  { %p473_p0 = por %p472_p13, %p471_p12 }
  0x1f   :  { %p474_p1 = pnand %p473_p0, %p467_p11 }
  0x21   :  { %477 = shalt.err (!%p474_p1)
}
  0x22   :  { %s532_s1 = smov 128   ;;  %s533_s17 = smov 8  }
  0x23   :  { %24 = dma.hbm_to_vmem [thread:$0]  %s634_s0, 256, %s19_s8, [#allocation3], %s532_s1, %s532_s1, %s533_s17  }
  0x24   :  { %s534_s20 = smov [#allocation7]   ;;  %s478_s24 = scalar_lea.hbm %s637_s3, 1024 }
  0x25   :  { %s44_s21 = sshll.u32 %s534_s20, 4  ;;  %p479_p2 = scmp.ne.s32.totalorder %s637_s3, %s478_s24  ;;  %s45_s21 = int_to_ptr.vmem [resolvable:$true] %s44_s21 }
  0x26   :  { %p482_p3 = scmp.lt.u32.totalorder %s478_s24, %s637_s3 }
  0x28   :  { %p484_p4 = pnand %p482_p3, %p479_p2 }
  0x2a   :  { %487 = shalt.err (!%p484_p4)
}
  0x2b   :  { %s488_s6 = scalar_lea.vmem %s45_s21, 1024  ;;  %p493_p6 = scmp.lt.s32.totalorder %s45_s21, %s45_s21 }
  0x2c   :  { %p489_p5 = scmp.ne.s32.totalorder %s45_s21, %s488_s6  ;;  %p494_p7 = scmp.lt.s32.totalorder %s488_s6, %s488_s6 }
  0x2e   :  { %p495_p8 = por %p494_p7, %p493_p6 }
  0x30   :  { %p496_p9 = pnand %p495_p8, %p489_p5 }
  0x32   :  { %499 = shalt.err (!%p496_p9)
}
  0x33   :  { %50 = dma.hbm_to_vmem [thread:$0]  %s637_s3, 1024, %s45_s21, [#allocation6], %s529_s28, %s529_s28, %s530_s29  }
  0x34   :  { %522 = dma.done.wait [#allocation3], 256  }
  0x35   :  { %523 = vsyncadd [#allocation3], 4294967040 }
  0x36   :  { %524 = dma.done.wait [#allocation6], 2048  }
  0x37   :  { %525 = vsyncadd [#allocation6], 4294965248  ;;  %v535_v0 = vmov 0.0   ;;  %vm536_vm0 = vmmov 0   ;;  %v418_v1 = vld [vmem:[#allocation5] sm:$0xff]   ;;  %v419_v2 = vld [vmem:[#allocation5 + $0x8] sm:$0xff]  }
  0x38   :  { %368 = vmatprep.subr.bf16.mxu0 %v535_v0  ;;  %384 = vmatprep.mubr.msk.bf16.mxu0 %vm536_vm0, %v535_v0  ;;  %v420_v3 = vld [vmem:[#allocation5 + $0x10] sm:$0xff]   ;;  %v426_v4 = vld [vmem:[#allocation7] sm:$0xff]   ;;  %v421_v5 = vld [vmem:[#allocation5 + $0x18] sm:$0xff]   ;;  %s537_s9 = smov [#allocation8]  }
  0x39   :  { %388 = vmatprep.subr.bf16.mxu1 %v535_v0  ;;  %404 = vmatprep.mubr.msk.bf16.mxu1 %vm536_vm0, %v535_v0  ;;  %v427_v6 = vld [vmem:[#allocation7 + $0x8] sm:$0xff]   ;;  %v422_v7 = vld [vmem:[#allocation5 + $0x20] sm:$0xff]   ;;  %v428_v8 = vld [vmem:[#allocation7 + $0x10] sm:$0xff]   ;;  %s319_s10 = sshll.u32 %s537_s9, 4  ;;  %s320_s10 = int_to_ptr.vmem [resolvable:$true] %s319_s10 }
  0x3a   :  { %369 = vmatpush3.bf16.msra.mxu0 %v418_v1  ;;  %389 = vmatpush3.bf16.msra.mxu1 %v426_v4  ;;  %v423_v9 = vld [vmem:[#allocation5 + $0x28] sm:$0xff]   ;;  %v429_v10 = vld [vmem:[#allocation7 + $0x18] sm:$0xff]   ;;  %v424_v11 = vld [vmem:[#allocation5 + $0x30] sm:$0xff]   ;;  %p505_p11 = scmp.lt.s32.totalorder %s320_s10, %s320_s10 }
  0x3b   :  { %370 = vmatprep.subr.bf16.mxu0 %v535_v0  ;;  %390 = vmatprep.subr.bf16.mxu1 %v535_v0  ;;  %v430_v12 = vld [vmem:[#allocation7 + $0x20] sm:$0xff]   ;;  %v425_v13 = vld [vmem:[#allocation5 + $0x38] sm:$0xff]   ;;  %v71_v14 = vld [vmem:[#allocation2] sm:$0xff] }
  0x3c   :  { %v72_v15 = vld [vmem:[#allocation2 + $0x8] sm:$0xff]  ;;  %v431_v16 = vld [vmem:[#allocation7 + $0x28] sm:$0xff]   ;;  %v432_v18 = vld [vmem:[#allocation7 + $0x30] sm:$0xff]  }
  0x3d   :  { %v73_v17 = vpack.c.bf16 %v72_v15, %v71_v14  ;;  %v433_v19 = vld [vmem:[#allocation7 + $0x38] sm:$0xff]   ;;  %v332_v20 = vld [vmem:[%s636_s2] ss:$0 sm:$0xff]  ;;  %s500_s2 = scalar_lea.vmem %s320_s10, 256 }
  0x3e   :  { %371 = vmatpush3.bf16.msra.mxu0 %v419_v2  ;;  %391 = vmatpush3.bf16.msra.mxu1 %v427_v6  ;;  %v349_v31 = vld [vmem:[%s638_s4] ss:$0 sm:$0xff]  ;;  %p501_p10 = scmp.ne.s32.totalorder %s320_s10, %s500_s2  ;;  %p506_p12 = scmp.lt.s32.totalorder %s500_s2, %s500_s2 }
  0x3f   :  { %372 = vmatprep.subr.bf16.mxu0 %v535_v0  ;;  %392 = vmatprep.subr.bf16.mxu1 %v535_v0 }
  0x40   :  { %p507_p13 = por %p506_p12, %p505_p11 }
  0x42   :  { %373 = vmatpush3.bf16.msra.mxu0 %v420_v3  ;;  %393 = vmatpush3.bf16.msra.mxu1 %v428_v8  ;;  %p508_p0 = pnand %p507_p13, %p501_p10 }
  0x43   :  { %374 = vmatprep.subr.bf16.mxu0 %v535_v0  ;;  %394 = vmatprep.subr.bf16.mxu1 %v535_v0 }
  0x46   :  { %375 = vmatpush3.bf16.msra.mxu0 %v421_v5  ;;  %395 = vmatpush3.bf16.msra.mxu1 %v429_v10 }
  0x47   :  { %376 = vmatprep.subr.bf16.mxu0 %v535_v0  ;;  %396 = vmatprep.subr.bf16.mxu1 %v535_v0 }
  0x4a   :  { %377 = vmatpush3.bf16.msra.mxu0 %v422_v7  ;;  %397 = vmatpush3.bf16.msra.mxu1 %v430_v12 }
  0x4b   :  { %378 = vmatprep.subr.bf16.mxu0 %v535_v0  ;;  %398 = vmatprep.subr.bf16.mxu1 %v535_v0 }
  0x4e   :  { %379 = vmatpush3.bf16.msra.mxu0 %v423_v9  ;;  %399 = vmatpush3.bf16.msra.mxu1 %v431_v16 }
  0x4f   :  { %380 = vmatprep.subr.bf16.mxu0 %v535_v0  ;;  %400 = vmatprep.subr.bf16.mxu1 %v535_v0 }
  0x52   :  { %381 = vmatpush3.bf16.msra.mxu0 %v424_v11  ;;  %401 = vmatpush3.bf16.msra.mxu1 %v432_v18 }
  0x53   :  { %382 = vmatprep.subr.bf16.mxu0 %v535_v0  ;;  %402 = vmatprep.subr.bf16.mxu1 %v535_v0 }
  0x56   :  { %383 = vmatpush3.bf16.msra.mxu0 %v425_v13  ;;  %403 = vmatpush3.bf16.msra.mxu1 %v433_v19 }
  0x59   :  { %385 = vmatmul.mubr.bf16.vlgmr.msra.gmra.mrb[0].mxu0 %v73_v17 }
 0x12c   :  { %v179_v21 = vpop.f32.mrb[0].mxu0 }
 0x12d   :  { %v180_v22 = vadd.f32 %v332_v20, %v179_v21  ;;  %v386_v23 = vpop.f32.mrb[1].mxu0 }
 0x12e   :  { %v182_v24 = vpop.f32.mrb[2].mxu0 }
 0x12f   :  { %v183_v25 = vadd.f32 %v332_v20, %v182_v24  ;;  %v387_v26 = vpop.f32.mrb[3].mxu0  ;;  %v186_v27 = vmax.f32 %v180_v22, 0.0 }
 0x131   :  { %v187_v28 = vmax.f32 %v183_v25, 0.0 }
 0x133   :  { %v188_v29 = vpack.c.bf16 %v187_v28, %v186_v27 }
 0x135   :  { %405 = vmatmul.mubr.bf16.vlgmr.msra.gmra.mrb[0].mxu1 %v188_v29 }
 0x208   :  { %v287_v30 = vpop.f32.mrb[0].mxu1 }
 0x209   :  { %v406_v32 = vpop.f32.mrb[1].mxu1  ;;  %v310_v35 = vadd.f32 %v349_v31, %v287_v30 }
 0x20a   :  { %v290_v33 = vpop.f32.mrb[2].mxu1 }
 0x20b   :  { %v407_v34 = vpop.f32.mrb[3].mxu1  ;;  %v311_v36 = vadd.f32 %v349_v31, %v290_v33  ;;  %312 = vst [vmem:[#allocation8] sm:$0xff] %v310_v35 }
 0x20d   :  { %313 = vst [vmem:[#allocation8 + $0x8] sm:$0xff] %v311_v36 }
 0x20e   :  { %511 = shalt.err (!%p508_p0)
}
 0x20f   :  { %s512_s4 = scalar_lea.hbm %s639_s5, 256 }
 0x210   :  { %p513_p1 = scmp.ne.s32.totalorder %s639_s5, %s512_s4  ;;  %p516_p2 = scmp.lt.u32.totalorder %s512_s4, %s639_s5 }
 0x212   :  { %p518_p3 = pnand %p516_p2, %p513_p1 }
 0x214   :  { %521 = shalt.err (!%p518_p3)
}
 0x215   :  { %325 = dma.vmem_to_hbm [thread:$0]  %s320_s10, 256, %s639_s5, [#allocation4], %s532_s1, %s532_s1, %s533_s17  }
 0x216   :  { %526 = dma.done.wait [#allocation4], 256  }
 0x217   :  { %527 = vsyncadd [#allocation4], 4294967040 }
 0x218   :  { %329 = vsyncpa [#allocation3], 1 }
 0x219   :  { %330 = vsyncpa [#allocation6], 1 }
 0x21a   :  { %331 = vsyncpa [#allocation4], 1 }

</bundles_post_ra>
